<compile_context>
chip_gen: v6e
topology: v6e:2x2x1
jax: 0.10.0
libtpu: 0.0.40
codegen_flags: <defaults>
</compile_context>

<pallas_src>
import functools

import jax
import jax.numpy as jnp
from jax.experimental import pallas as pl
from jax.experimental.pallas import tpu as pltpu


def _fasternet_kernel(x_ref, x1_ref, w3_ref, mask_ref, w1s_ref, w1t_ref,
                      b_ref, w2_ref, o_ref, conv_ref, *, w_dim):
    """One grid step == (batch element i, spatial tile j).

    Layout: channels on sublanes, flattened H*W on lanes.

    x_ref    : (C,  TILE)     f32  current spatial tile of the input (residual)
    x1_ref   : (C3, HWp)      f32  full image, first C3 channels (invariant in j)
    w3_ref   : (9,  C3, C3)   bf16 3x3 partial-conv weight, tap-major (out, in)
    mask_ref : (9,  1,  HWp)  f32  per-tap boundary masks (emulate zero padding)
    w1s_ref  : (Ce, C)        bf16 conv1 weight with BN scale folded in
    w1t_ref  : (Ce, C3)       bf16 first C3 columns of w1s (pre-split in wrapper)
    b_ref    : (Ce, 1)        f32  folded BN bias
    w2_ref   : (C,  Ce)       bf16 conv2 weight
    o_ref    : (C,  TILE)     f32  output tile
    conv_ref : (C3, HWp)      f32  scratch: pconv(x1) - x1, filled at j == 0
    """
    j = pl.program_id(1)
    tile_hw = x_ref.shape[-1]
    hwp = conv_ref.shape[-1]

    # ---- 3x3 partial conv: once per batch element, full image, into scratch ----
    @pl.when(j == 0)
    def _():
        x1f = x1_ref[...]                                  # (C3, HWp) f32
        acc = jnp.zeros(conv_ref.shape, jnp.float32)
        k = 0
        for dy in (-1, 0, 1):
            for dx in (-1, 0, 1):
                sh = (-(dy * w_dim + dx)) % hwp            # lane roll (XLU)
                tap = pltpu.roll(x1f, shift=sh, axis=1) if sh else x1f
                tap = (tap * mask_ref[k]).astype(jnp.bfloat16)
                acc = acc + jnp.dot(w3_ref[k], tap,
                                    preferred_element_type=jnp.float32)
                k += 1
        # store pconv(x1) - x1 so the per-tile path needs no channel slicing of x
        conv_ref[...] = acc - x1f

    # ---- per-tile: 1x1 conv -> (folded BN) bias + ReLU -> 1x1 conv -> residual ----
    x_t = x_ref[...]                                       # (C, TILE) f32
    start = pl.multiple_of(j * tile_hw, tile_hw)           # lane-aligned slice
    d_t = conv_ref[:, pl.ds(start, tile_hw)]               # (C3, TILE) f32

    hid = jnp.dot(w1s_ref[...], x_t.astype(jnp.bfloat16),
                  preferred_element_type=jnp.float32)
    hid = hid + jnp.dot(w1t_ref[...], d_t.astype(jnp.bfloat16),
                        preferred_element_type=jnp.float32)
    hid = jnp.maximum(hid + b_ref[...], 0.0)               # BN bias + ReLU (f32)

    y = jnp.dot(w2_ref[...], hid.astype(jnp.bfloat16),
                preferred_element_type=jnp.float32)
    o_ref[...] = x_t + y                                   # DropPath(0.0) == identity


def _round_up(x, m):
    return ((x + m - 1) // m) * m


def _choose_tile_hw(hw, c):
    """Spatial (lane) tile: multiple of 128, ~2 MiB per (C, TILE) f32 block."""
    lane = 128
    hw_ceil = _round_up(hw, lane)
    t = (2 * 1024 * 1024) // max(c * 4, 1)
    t = max(lane, (t // lane) * lane)
    return min(t, 4096, hw_ceil)


@jax.jit
def fasternet_block(x_nchw, params):
    """FasterNetBlock forward. x_nchw: (N, C, H, W) float32 -> same shape."""
    w3, w1, w2 = params["w3"], params["w1"], params["w2"]
    gamma, beta = params["gamma"], params["beta"]
    run_mean, run_var = params["mean"], params["var"]
    eps = 1e-5

    n, c, h_dim, w_dim = x_nchw.shape
    c3 = c // 4                              # PartialConv n_div = 4
    ce = w1.shape[0]                         # dim * expand_ratio
    hw = h_dim * w_dim

    tile_hw = _choose_tile_hw(hw, c)
    hw_pad = _round_up(hw, tile_hw)
    num_tiles = hw_pad // tile_hw

    # NCHW flattened == channels-on-sublane / spatial-on-lane; no transpose.
    x_flat = x_nchw.astype(jnp.float32).reshape(n, c, hw)
    if hw_pad != hw:
        x_flat = jnp.pad(x_flat, ((0, 0), (0, 0), (0, hw_pad - hw)))
    x1_flat = x_flat[:, :c3, :]              # first C3 channels, full image

    # ---- weight prep (one-time, off the hot path) ----
    scale = gamma / jnp.sqrt(run_var + eps)
    w1_full = w1[:, :, 0, 0] * scale[:, None]            # fold BN scale into conv1
    w1s = w1_full.astype(jnp.bfloat16)                   # (Ce, C)
    w1t = w1_full[:, :c3].astype(jnp.bfloat16)           # (Ce, C3) pre-split
    bias = (beta - run_mean * scale).reshape(ce, 1).astype(jnp.float32)
    w2_k = w2[:, :, 0, 0].astype(jnp.bfloat16)           # (C, Ce)
    w3_k = jnp.transpose(w3, (2, 3, 0, 1)).reshape(9, c3, c3).astype(jnp.bfloat16)

    # ---- boundary masks for the 9 shifted taps (zero-padding emulation) ----
    ii = jnp.arange(hw_pad, dtype=jnp.int32)
    hh, ww = ii // w_dim, ii % w_dim
    in_img = ii < hw
    masks = []
    for dy in (-1, 0, 1):
        for dx in (-1, 0, 1):
            masks.append((hh + dy >= 0) & (hh + dy < h_dim) &
                         (ww + dx >= 0) & (ww + dx < w_dim) & in_img)
    mask9 = jnp.stack(masks).reshape(9, 1, hw_pad).astype(jnp.float32)

    kernel = functools.partial(_fasternet_kernel, w_dim=w_dim)

    # explicit VMEM budget (double-buffered x/out tiles + x1 + scratch + masks)
    est = (2 * 2 * c * tile_hw * 4
           + 3 * c3 * hw_pad * 4
           + 9 * hw_pad * 4
           + 4 * ce * tile_hw * 4)
    vmem_limit = int(min(48 * 1024 * 1024, max(16 * 1024 * 1024, 2 * est)))

    out_flat = pl.pallas_call(
        kernel,
        out_shape=jax.ShapeDtypeStruct((n, c, hw_pad), jnp.float32),
        grid_spec=pltpu.PrefetchScalarGridSpec(
            num_scalar_prefetch=0,
            grid=(n, num_tiles),
            in_specs=[
                pl.BlockSpec((None, c, tile_hw), lambda i, j: (i, 0, j)),
                pl.BlockSpec((None, c3, hw_pad), lambda i, j: (i, 0, 0)),
                pl.BlockSpec((9, c3, c3), lambda i, j: (0, 0, 0)),
                pl.BlockSpec((9, 1, hw_pad), lambda i, j: (0, 0, 0)),
                pl.BlockSpec((ce, c), lambda i, j: (0, 0)),
                pl.BlockSpec((ce, c3), lambda i, j: (0, 0)),
                pl.BlockSpec((ce, 1), lambda i, j: (0, 0)),
                pl.BlockSpec((c, ce), lambda i, j: (0, 0)),
            ],
            out_specs=pl.BlockSpec((None, c, tile_hw), lambda i, j: (i, 0, j)),
            scratch_shapes=[pltpu.VMEM((c3, hw_pad), jnp.float32)],
        ),
        compiler_params=pltpu.CompilerParams(
            dimension_semantics=("parallel", "arbitrary"),
            vmem_limit_bytes=vmem_limit),
        input_output_aliases={0: 0},         # output aliases the x slab
    )(x_flat, x1_flat, w3_k, mask9, w1s, w1t, bias, w2_k)

    return out_flat[:, :, :hw].reshape(n, c, h_dim, w_dim)


def ref_forward(x_nchw, params):
    """Plain-JAX reference of the PyTorch forward (BN in eval mode)."""
    w3, w1, w2 = params["w3"], params["w1"], params["w2"]
    gamma, beta = params["gamma"], params["beta"]
    mean, var = params["mean"], params["var"]
    eps = 1e-5
    c = x_nchw.shape[1]
    c3 = c // 4

    x1 = x_nchw[:, :c3]
    y1 = jax.lax.conv_general_dilated(
        x1, w3, window_strides=(1, 1), padding="SAME",
        dimension_numbers=("NCHW", "OIHW", "NCHW"))
    xp = jnp.concatenate([y1, x_nchw[:, c3:]], axis=1)

    hid = jnp.einsum("nchw,oc->nohw", xp, w1[:, :, 0, 0])
    hid = ((hid - mean[None, :, None, None]) /
           jnp.sqrt(var[None, :, None, None] + eps) *
           gamma[None, :, None, None] + beta[None, :, None, None])
    hid = jnp.maximum(hid, 0.0)
    y = jnp.einsum("nehw,oe->nohw", hid, w2[:, :, 0, 0])
    return x_nchw + y


if __name__ == "__main__":
    # Small FasterNetBlock-consistent shapes: dim=8, expand_ratio=2, 16x16 spatial.
    N, C, H, W = 2, 8, 16, 16
    EXPAND = 2
    CE = C * EXPAND
    C3 = C // 4

    key = jax.random.PRNGKey(0)
    k = jax.random.split(key, 8)
    x = jax.random.normal(k[0], (N, C, H, W), jnp.float32)

    params = {
        "w3": jax.random.normal(k[1], (C3, C3, 3, 3), jnp.float32) * 0.2,
        "w1": jax.random.normal(k[2], (CE, C, 1, 1), jnp.float32) * 0.2,
        "w2": jax.random.normal(k[3], (C, CE, 1, 1), jnp.float32) * 0.2,
        "gamma": jax.random.normal(k[4], (CE,), jnp.float32) * 0.1 + 1.0,
        "beta": jax.random.normal(k[5], (CE,), jnp.float32) * 0.1,
        "mean": jax.random.normal(k[6], (CE,), jnp.float32) * 0.1,
        "var": jnp.abs(jax.random.normal(k[7], (CE,), jnp.float32)) * 0.5 + 0.5,
    }
    # TODO(synk): DropPath(rate=0.0) is nn.Identity (no-op); BatchNorm is
    # implemented in eval (running-stats) mode only.

    out = jax.block_until_ready(fasternet_block(x, params))
    ref = ref_forward(x, params)

    assert out.shape == (N, C, H, W)
    max_err = float(jnp.max(jnp.abs(out - ref)))
    # bf16 MXU operands (f32 accumulation) -> loosened tolerance vs pure f32.
    assert jnp.allclose(out, ref, atol=5e-2, rtol=5e-2), max_err
    print("KERNEL_OK")
</pallas_src>

<mosaic_0001>
module attributes {stable_mosaic.version = 11 : i64} {
  func.func @_fasternet_kernel(%arg0: i32, %arg1: i32, %arg2: memref<1x8x256xf32, #tpu.memory_space<vmem>>, %arg3: memref<1x2x256xf32, #tpu.memory_space<vmem>>, %arg4: memref<9x2x2xbf16, #tpu.memory_space<vmem>>, %arg5: memref<9x1x256xf32, #tpu.memory_space<vmem>>, %arg6: memref<16x8xbf16, #tpu.memory_space<vmem>>, %arg7: memref<16x2xbf16, #tpu.memory_space<vmem>>, %arg8: memref<16x1xf32, #tpu.memory_space<vmem>>, %arg9: memref<8x16xbf16, #tpu.memory_space<vmem>>, %arg10: memref<1x8x256xf32, #tpu.memory_space<vmem>>, %arg11: memref<2x256xf32, #tpu.memory_space<vmem>>) attributes {dimension_semantics = [#tpu.dimension_semantics<parallel>, #tpu.dimension_semantics<arbitrary>], iteration_bounds = array<i64: 2, 1>, scalar_prefetch = 0 : i64, scratch_operands = 1 : i64, tpu.core_type = #tpu.core_type<tc>, window_params = [{transform_indices = @transform_0, window_bounds = array<i64: 1, 8, 256>}, {transform_indices = @transform_1, window_bounds = array<i64: 1, 2, 256>}, {pipeline_mode = #tpu.pipeline_mode<synchronous>, transform_indices = @transform_2, window_bounds = array<i64: 9, 2, 2>}, {pipeline_mode = #tpu.pipeline_mode<synchronous>, transform_indices = @transform_3, window_bounds = array<i64: 9, 1, 256>}, {pipeline_mode = #tpu.pipeline_mode<synchronous>, transform_indices = @transform_4, window_bounds = array<i64: 16, 8>}, {pipeline_mode = #tpu.pipeline_mode<synchronous>, transform_indices = @transform_5, window_bounds = array<i64: 16, 2>}, {pipeline_mode = #tpu.pipeline_mode<synchronous>, transform_indices = @transform_6, window_bounds = array<i64: 16, 1>}, {pipeline_mode = #tpu.pipeline_mode<synchronous>, transform_indices = @transform_7, window_bounds = array<i64: 8, 16>}, {transform_indices = @transform_8, window_bounds = array<i64: 1, 8, 256>}]} {
    %c0_i32 = arith.constant 0 : i32
    %0 = arith.cmpi eq, %arg1, %c0_i32 : i32
    %1 = arith.extui %0 : i1 to i32
    %c0_i32_0 = arith.constant 0 : i32
    %2 = arith.cmpi ne, %1, %c0_i32_0 : i32
    scf.if %2 {
      %c0_18 = arith.constant 0 : index
      %c0_19 = arith.constant 0 : index
      %c0_20 = arith.constant 0 : index
      %28 = vector.load %arg3[%c0_18, %c0_19, %c0_20] : memref<1x2x256xf32, #tpu.memory_space<vmem>>, vector<1x2x256xf32>
      %29 = vector.shape_cast %28 : vector<1x2x256xf32> to vector<2x256xf32>
      %cst_21 = arith.constant 0.000000e+00 : f32
      %30 = vector.broadcast %cst_21 : f32 to vector<2x256xf32>
      %c17_i32 = arith.constant 17 : i32
      %31 = tpu.dynamic_rotate %29 by %c17_i32 dim 1 : vector<2x256xf32>, i32 -> vector<2x256xf32>
      %c0_22 = arith.constant 0 : index
      %c0_23 = arith.constant 0 : index
      %c0_24 = arith.constant 0 : index
      %32 = vector.load %arg5[%c0_22, %c0_23, %c0_24] : memref<9x1x256xf32, #tpu.memory_space<vmem>>, vector<1x1x256xf32>
      %33 = vector.shape_cast %32 : vector<1x1x256xf32> to vector<1x256xf32>
      %34 = vector.broadcast %33 : vector<1x256xf32> to vector<2x256xf32>
      %35 = arith.mulf %31, %34 : vector<2x256xf32>
      %36 = arith.truncf %35 : vector<2x256xf32> to vector<2x256xbf16>
      %c0_25 = arith.constant 0 : index
      %c0_26 = arith.constant 0 : index
      %c0_27 = arith.constant 0 : index
      %37 = vector.load %arg4[%c0_25, %c0_26, %c0_27] : memref<9x2x2xbf16, #tpu.memory_space<vmem>>, vector<1x2x2xbf16>
      %38 = vector.shape_cast %37 : vector<1x2x2xbf16> to vector<2x2xbf16>
      %cst_28 = arith.constant dense<0.000000e+00> : vector<2x256xf32>
      %39 = tpu.matmul %38, %36, %cst_28 {dimension_numbers = #tpu.dot_dimension_numbers<[1], [0], [0], [1], [0, 0, 1, 1], [], []>} : vector<2x2xbf16>, vector<2x256xbf16>, vector<2x256xf32> -> vector<2x256xf32>
      %40 = arith.addf %30, %39 : vector<2x256xf32>
      %c16_i32 = arith.constant 16 : i32
      %41 = tpu.dynamic_rotate %29 by %c16_i32 dim 1 : vector<2x256xf32>, i32 -> vector<2x256xf32>
      %c1 = arith.constant 1 : index
      %c0_29 = arith.constant 0 : index
      %c0_30 = arith.constant 0 : index
      %42 = vector.load %arg5[%c1, %c0_29, %c0_30] : memref<9x1x256xf32, #tpu.memory_space<vmem>>, vector<1x1x256xf32>
      %43 = vector.shape_cast %42 : vector<1x1x256xf32> to vector<1x256xf32>
      %44 = vector.broadcast %43 : vector<1x256xf32> to vector<2x256xf32>
      %45 = arith.mulf %41, %44 : vector<2x256xf32>
      %46 = arith.truncf %45 : vector<2x256xf32> to vector<2x256xbf16>
      %c1_31 = arith.constant 1 : index
      %c0_32 = arith.constant 0 : index
      %c0_33 = arith.constant 0 : index
      %47 = vector.load %arg4[%c1_31, %c0_32, %c0_33] : memref<9x2x2xbf16, #tpu.memory_space<vmem>>, vector<1x2x2xbf16>
      %48 = vector.shape_cast %47 : vector<1x2x2xbf16> to vector<2x2xbf16>
      %cst_34 = arith.constant dense<0.000000e+00> : vector<2x256xf32>
      %49 = tpu.matmul %48, %46, %cst_34 {dimension_numbers = #tpu.dot_dimension_numbers<[1], [0], [0], [1], [0, 0, 1, 1], [], []>} : vector<2x2xbf16>, vector<2x256xbf16>, vector<2x256xf32> -> vector<2x256xf32>
      %50 = arith.addf %40, %49 : vector<2x256xf32>
      %c15_i32 = arith.constant 15 : i32
      %51 = tpu.dynamic_rotate %29 by %c15_i32 dim 1 : vector<2x256xf32>, i32 -> vector<2x256xf32>
      %c2 = arith.constant 2 : index
      %c0_35 = arith.constant 0 : index
      %c0_36 = arith.constant 0 : index
      %52 = vector.load %arg5[%c2, %c0_35, %c0_36] : memref<9x1x256xf32, #tpu.memory_space<vmem>>, vector<1x1x256xf32>
      %53 = vector.shape_cast %52 : vector<1x1x256xf32> to vector<1x256xf32>
      %54 = vector.broadcast %53 : vector<1x256xf32> to vector<2x256xf32>
      %55 = arith.mulf %51, %54 : vector<2x256xf32>
      %56 = arith.truncf %55 : vector<2x256xf32> to vector<2x256xbf16>
      %c2_37 = arith.constant 2 : index
      %c0_38 = arith.constant 0 : index
      %c0_39 = arith.constant 0 : index
      %57 = vector.load %arg4[%c2_37, %c0_38, %c0_39] : memref<9x2x2xbf16, #tpu.memory_space<vmem>>, vector<1x2x2xbf16>
      %58 = vector.shape_cast %57 : vector<1x2x2xbf16> to vector<2x2xbf16>
      %cst_40 = arith.constant dense<0.000000e+00> : vector<2x256xf32>
      %59 = tpu.matmul %58, %56, %cst_40 {dimension_numbers = #tpu.dot_dimension_numbers<[1], [0], [0], [1], [0, 0, 1, 1], [], []>} : vector<2x2xbf16>, vector<2x256xbf16>, vector<2x256xf32> -> vector<2x256xf32>
      %60 = arith.addf %50, %59 : vector<2x256xf32>
      %c1_i32 = arith.constant 1 : i32
      %61 = tpu.dynamic_rotate %29 by %c1_i32 dim 1 : vector<2x256xf32>, i32 -> vector<2x256xf32>
      %c3 = arith.constant 3 : index
      %c0_41 = arith.constant 0 : index
      %c0_42 = arith.constant 0 : index
      %62 = vector.load %arg5[%c3, %c0_41, %c0_42] : memref<9x1x256xf32, #tpu.memory_space<vmem>>, vector<1x1x256xf32>
      %63 = vector.shape_cast %62 : vector<1x1x256xf32> to vector<1x256xf32>
      %64 = vector.broadcast %63 : vector<1x256xf32> to vector<2x256xf32>
      %65 = arith.mulf %61, %64 : vector<2x256xf32>
      %66 = arith.truncf %65 : vector<2x256xf32> to vector<2x256xbf16>
      %c3_43 = arith.constant 3 : index
      %c0_44 = arith.constant 0 : index
      %c0_45 = arith.constant 0 : index
      %67 = vector.load %arg4[%c3_43, %c0_44, %c0_45] : memref<9x2x2xbf16, #tpu.memory_space<vmem>>, vector<1x2x2xbf16>
      %68 = vector.shape_cast %67 : vector<1x2x2xbf16> to vector<2x2xbf16>
      %cst_46 = arith.constant dense<0.000000e+00> : vector<2x256xf32>
      %69 = tpu.matmul %68, %66, %cst_46 {dimension_numbers = #tpu.dot_dimension_numbers<[1], [0], [0], [1], [0, 0, 1, 1], [], []>} : vector<2x2xbf16>, vector<2x256xbf16>, vector<2x256xf32> -> vector<2x256xf32>
      %70 = arith.addf %60, %69 : vector<2x256xf32>
      %c4 = arith.constant 4 : index
      %c0_47 = arith.constant 0 : index
      %c0_48 = arith.constant 0 : index
      %71 = vector.load %arg5[%c4, %c0_47, %c0_48] : memref<9x1x256xf32, #tpu.memory_space<vmem>>, vector<1x1x256xf32>
      %72 = vector.shape_cast %71 : vector<1x1x256xf32> to vector<1x256xf32>
      %73 = vector.broadcast %72 : vector<1x256xf32> to vector<2x256xf32>
      %74 = arith.mulf %29, %73 : vector<2x256xf32>
      %75 = arith.truncf %74 : vector<2x256xf32> to vector<2x256xbf16>
      %c4_49 = arith.constant 4 : index
      %c0_50 = arith.constant 0 : index
      %c0_51 = arith.constant 0 : index
      %76 = vector.load %arg4[%c4_49, %c0_50, %c0_51] : memref<9x2x2xbf16, #tpu.memory_space<vmem>>, vector<1x2x2xbf16>
      %77 = vector.shape_cast %76 : vector<1x2x2xbf16> to vector<2x2xbf16>
      %cst_52 = arith.constant dense<0.000000e+00> : vector<2x256xf32>
      %78 = tpu.matmul %77, %75, %cst_52 {dimension_numbers = #tpu.dot_dimension_numbers<[1], [0], [0], [1], [0, 0, 1, 1], [], []>} : vector<2x2xbf16>, vector<2x256xbf16>, vector<2x256xf32> -> vector<2x256xf32>
      %79 = arith.addf %70, %78 : vector<2x256xf32>
      %c255_i32 = arith.constant 255 : i32
      %80 = tpu.dynamic_rotate %29 by %c255_i32 dim 1 : vector<2x256xf32>, i32 -> vector<2x256xf32>
      %c5 = arith.constant 5 : index
      %c0_53 = arith.constant 0 : index
      %c0_54 = arith.constant 0 : index
      %81 = vector.load %arg5[%c5, %c0_53, %c0_54] : memref<9x1x256xf32, #tpu.memory_space<vmem>>, vector<1x1x256xf32>
      %82 = vector.shape_cast %81 : vector<1x1x256xf32> to vector<1x256xf32>
      %83 = vector.broadcast %82 : vector<1x256xf32> to vector<2x256xf32>
      %84 = arith.mulf %80, %83 : vector<2x256xf32>
      %85 = arith.truncf %84 : vector<2x256xf32> to vector<2x256xbf16>
      %c5_55 = arith.constant 5 : index
      %c0_56 = arith.constant 0 : index
      %c0_57 = arith.constant 0 : index
      %86 = vector.load %arg4[%c5_55, %c0_56, %c0_57] : memref<9x2x2xbf16, #tpu.memory_space<vmem>>, vector<1x2x2xbf16>
      %87 = vector.shape_cast %86 : vector<1x2x2xbf16> to vector<2x2xbf16>
      %cst_58 = arith.constant dense<0.000000e+00> : vector<2x256xf32>
      %88 = tpu.matmul %87, %85, %cst_58 {dimension_numbers = #tpu.dot_dimension_numbers<[1], [0], [0], [1], [0, 0, 1, 1], [], []>} : vector<2x2xbf16>, vector<2x256xbf16>, vector<2x256xf32> -> vector<2x256xf32>
      %89 = arith.addf %79, %88 : vector<2x256xf32>
      %c241_i32 = arith.constant 241 : i32
      %90 = tpu.dynamic_rotate %29 by %c241_i32 dim 1 : vector<2x256xf32>, i32 -> vector<2x256xf32>
      %c6 = arith.constant 6 : index
      %c0_59 = arith.constant 0 : index
      %c0_60 = arith.constant 0 : index
      %91 = vector.load %arg5[%c6, %c0_59, %c0_60] : memref<9x1x256xf32, #tpu.memory_space<vmem>>, vector<1x1x256xf32>
      %92 = vector.shape_cast %91 : vector<1x1x256xf32> to vector<1x256xf32>
      %93 = vector.broadcast %92 : vector<1x256xf32> to vector<2x256xf32>
      %94 = arith.mulf %90, %93 : vector<2x256xf32>
      %95 = arith.truncf %94 : vector<2x256xf32> to vector<2x256xbf16>
      %c6_61 = arith.constant 6 : index
      %c0_62 = arith.constant 0 : index
      %c0_63 = arith.constant 0 : index
      %96 = vector.load %arg4[%c6_61, %c0_62, %c0_63] : memref<9x2x2xbf16, #tpu.memory_space<vmem>>, vector<1x2x2xbf16>
      %97 = vector.shape_cast %96 : vector<1x2x2xbf16> to vector<2x2xbf16>
      %cst_64 = arith.constant dense<0.000000e+00> : vector<2x256xf32>
      %98 = tpu.matmul %97, %95, %cst_64 {dimension_numbers = #tpu.dot_dimension_numbers<[1], [0], [0], [1], [0, 0, 1, 1], [], []>} : vector<2x2xbf16>, vector<2x256xbf16>, vector<2x256xf32> -> vector<2x256xf32>
      %99 = arith.addf %89, %98 : vector<2x256xf32>
      %c240_i32 = arith.constant 240 : i32
      %100 = tpu.dynamic_rotate %29 by %c240_i32 dim 1 : vector<2x256xf32>, i32 -> vector<2x256xf32>
      %c7 = arith.constant 7 : index
      %c0_65 = arith.constant 0 : index
      %c0_66 = arith.constant 0 : index
      %101 = vector.load %arg5[%c7, %c0_65, %c0_66] : memref<9x1x256xf32, #tpu.memory_space<vmem>>, vector<1x1x256xf32>
      %102 = vector.shape_cast %101 : vector<1x1x256xf32> to vector<1x256xf32>
      %103 = vector.broadcast %102 : vector<1x256xf32> to vector<2x256xf32>
      %104 = arith.mulf %100, %103 : vector<2x256xf32>
      %105 = arith.truncf %104 : vector<2x256xf32> to vector<2x256xbf16>
      %c7_67 = arith.constant 7 : index
      %c0_68 = arith.constant 0 : index
      %c0_69 = arith.constant 0 : index
      %106 = vector.load %arg4[%c7_67, %c0_68, %c0_69] : memref<9x2x2xbf16, #tpu.memory_space<vmem>>, vector<1x2x2xbf16>
      %107 = vector.shape_cast %106 : vector<1x2x2xbf16> to vector<2x2xbf16>
      %cst_70 = arith.constant dense<0.000000e+00> : vector<2x256xf32>
      %108 = tpu.matmul %107, %105, %cst_70 {dimension_numbers = #tpu.dot_dimension_numbers<[1], [0], [0], [1], [0, 0, 1, 1], [], []>} : vector<2x2xbf16>, vector<2x256xbf16>, vector<2x256xf32> -> vector<2x256xf32>
      %109 = arith.addf %99, %108 : vector<2x256xf32>
      %c239_i32 = arith.constant 239 : i32
      %110 = tpu.dynamic_rotate %29 by %c239_i32 dim 1 : vector<2x256xf32>, i32 -> vector<2x256xf32>
      %c8 = arith.constant 8 : index
      %c0_71 = arith.constant 0 : index
      %c0_72 = arith.constant 0 : index
      %111 = vector.load %arg5[%c8, %c0_71, %c0_72] : memref<9x1x256xf32, #tpu.memory_space<vmem>>, vector<1x1x256xf32>
      %112 = vector.shape_cast %111 : vector<1x1x256xf32> to vector<1x256xf32>
      %113 = vector.broadcast %112 : vector<1x256xf32> to vector<2x256xf32>
      %114 = arith.mulf %110, %113 : vector<2x256xf32>
      %115 = arith.truncf %114 : vector<2x256xf32> to vector<2x256xbf16>
      %c8_73 = arith.constant 8 : index
      %c0_74 = arith.constant 0 : index
      %c0_75 = arith.constant 0 : index
      %116 = vector.load %arg4[%c8_73, %c0_74, %c0_75] : memref<9x2x2xbf16, #tpu.memory_space<vmem>>, vector<1x2x2xbf16>
      %117 = vector.shape_cast %116 : vector<1x2x2xbf16> to vector<2x2xbf16>
      %cst_76 = arith.constant dense<0.000000e+00> : vector<2x256xf32>
      %118 = tpu.matmul %117, %115, %cst_76 {dimension_numbers = #tpu.dot_dimension_numbers<[1], [0], [0], [1], [0, 0, 1, 1], [], []>} : vector<2x2xbf16>, vector<2x256xbf16>, vector<2x256xf32> -> vector<2x256xf32>
      %119 = arith.addf %109, %118 : vector<2x256xf32>
      %120 = arith.subf %119, %29 : vector<2x256xf32>
      %c0_77 = arith.constant 0 : index
      %c0_78 = arith.constant 0 : index
      %121 = vector.load %arg11[%c0_77, %c0_78] : memref<2x256xf32, #tpu.memory_space<vmem>>, vector<2x256xf32>
      tpu.vector_store %arg11[%c0_77, %c0_78], %120 {strides = array<i32>} : memref<2x256xf32, #tpu.memory_space<vmem>>, vector<2x256xf32>,
    } else {
    }
    %c0 = arith.constant 0 : index
    %c0_1 = arith.constant 0 : index
    %c0_2 = arith.constant 0 : index
    %3 = vector.load %arg2[%c0, %c0_1, %c0_2] : memref<1x8x256xf32, #tpu.memory_space<vmem>>, vector<1x8x256xf32>
    %4 = vector.shape_cast %3 : vector<1x8x256xf32> to vector<8x256xf32>
    %c256_i32 = arith.constant 256 : i32
    %5 = arith.muli %arg1, %c256_i32 : i32
    %6 = tpu.assume_multiple %5, 256 : i32
    %c0_3 = arith.constant 0 : index
    %7 = arith.index_cast %6 : i32 to index
    %8 = vector.load %arg11[%c0_3, %7] : memref<2x256xf32, #tpu.memory_space<vmem>>, vector<2x256xf32>
    %c0_4 = arith.constant 0 : index
    %c0_5 = arith.constant 0 : index
    %9 = vector.load %arg6[%c0_4, %c0_5] : memref<16x8xbf16, #tpu.memory_space<vmem>>, vector<16x8xbf16>
    %10 = arith.truncf %4 : vector<8x256xf32> to vector<8x256xbf16>
    %cst = arith.constant dense<0.000000e+00> : vector<16x256xf32>
    %11 = tpu.matmul %9, %10, %cst {dimension_numbers = #tpu.dot_dimension_numbers<[1], [0], [0], [1], [0, 0, 1, 1], [], []>} : vector<16x8xbf16>, vector<8x256xbf16>, vector<16x256xf32> -> vector<16x256xf32>
    %c0_6 = arith.constant 0 : index
    %c0_7 = arith.constant 0 : index
    %12 = vector.load %arg7[%c0_6, %c0_7] : memref<16x2xbf16, #tpu.memory_space<vmem>>, vector<16x2xbf16>
    %13 = arith.truncf %8 : vector<2x256xf32> to vector<2x256xbf16>
    %cst_8 = arith.constant dense<0.000000e+00> : vector<16x256xf32>
    %14 = tpu.matmul %12, %13, %cst_8 {dimension_numbers = #tpu.dot_dimension_numbers<[1], [0], [0], [1], [0, 0, 1, 1], [], []>} : vector<16x2xbf16>, vector<2x256xbf16>, vector<16x256xf32> -> vector<16x256xf32>
    %15 = arith.addf %11, %14 : vector<16x256xf32>
    %c0_9 = arith.constant 0 : index
    %c0_10 = arith.constant 0 : index
    %16 = vector.load %arg8[%c0_9, %c0_10] : memref<16x1xf32, #tpu.memory_space<vmem>>, vector<16x1xf32>
    %17 = vector.broadcast %16 : vector<16x1xf32> to vector<16x256xf32>
    %18 = arith.addf %15, %17 : vector<16x256xf32>
    %cst_11 = arith.constant 0.000000e+00 : f32
    %19 = vector.broadcast %cst_11 : f32 to vector<16x256xf32>
    %20 = arith.maximumf %18, %19 : vector<16x256xf32>
    %c0_12 = arith.constant 0 : index
    %c0_13 = arith.constant 0 : index
    %21 = vector.load %arg9[%c0_12, %c0_13] : memref<8x16xbf16, #tpu.memory_space<vmem>>, vector<8x16xbf16>
    %22 = arith.truncf %20 : vector<16x256xf32> to vector<16x256xbf16>
    %cst_14 = arith.constant dense<0.000000e+00> : vector<8x256xf32>
    %23 = tpu.matmul %21, %22, %cst_14 {dimension_numbers = #tpu.dot_dimension_numbers<[1], [0], [0], [1], [0, 0, 1, 1], [], []>} : vector<8x16xbf16>, vector<16x256xbf16>, vector<8x256xf32> -> vector<8x256xf32>
    %24 = arith.addf %4, %23 : vector<8x256xf32>
    %c0_15 = arith.constant 0 : index
    %c0_16 = arith.constant 0 : index
    %c0_17 = arith.constant 0 : index
    %25 = vector.load %arg10[%c0_15, %c0_16, %c0_17] : memref<1x8x256xf32, #tpu.memory_space<vmem>>, vector<1x8x256xf32>
    %26 = vector.shape_cast %25 : vector<1x8x256xf32> to vector<8x256xf32>
    %27 = vector.shape_cast %24 : vector<8x256xf32> to vector<1x8x256xf32>
    tpu.vector_store %arg10[%c0_15, %c0_16, %c0_17], %27 {strides = array<i32>} : memref<1x8x256xf32, #tpu.memory_space<vmem>>, vector<1x8x256xf32>,
    return
  }
  func.func @transform_0(%arg0: i32, %arg1: i32) -> (i32, i32, i32) {
    %c0_i32 = arith.constant 0 : i32
    %c0_i32_0 = arith.constant 0 : i32
    return %arg0, %c0_i32, %arg1 : i32, i32, i32
  }
  func.func @transform_1(%arg0: i32, %arg1: i32) -> (i32, i32, i32) {
    %c0_i32 = arith.constant 0 : i32
    %c0_i32_0 = arith.constant 0 : i32
    %c0_i32_1 = arith.constant 0 : i32
    return %arg0, %c0_i32, %c0_i32_0 : i32, i32, i32
  }
  func.func @transform_2(%arg0: i32, %arg1: i32) -> (i32, i32, i32) {
    %c0_i32 = arith.constant 0 : i32
    %c0_i32_0 = arith.constant 0 : i32
    %c0_i32_1 = arith.constant 0 : i32
    %c0_i32_2 = arith.constant 0 : i32
    return %c0_i32, %c0_i32_0, %c0_i32_1 : i32, i32, i32
  }
  func.func @transform_3(%arg0: i32, %arg1: i32) -> (i32, i32, i32) {
    %c0_i32 = arith.constant 0 : i32
    %c0_i32_0 = arith.constant 0 : i32
    %c0_i32_1 = arith.constant 0 : i32
    %c0_i32_2 = arith.constant 0 : i32
    return %c0_i32, %c0_i32_0, %c0_i32_1 : i32, i32, i32
  }
  func.func @transform_4(%arg0: i32, %arg1: i32) -> (i32, i32) {
    %c0_i32 = arith.constant 0 : i32
    %c0_i32_0 = arith.constant 0 : i32
    %c0_i32_1 = arith.constant 0 : i32
    return %c0_i32, %c0_i32_0 : i32, i32
  }
  func.func @transform_5(%arg0: i32, %arg1: i32) -> (i32, i32) {
    %c0_i32 = arith.constant 0 : i32
    %c0_i32_0 = arith.constant 0 : i32
    %c0_i32_1 = arith.constant 0 : i32
    return %c0_i32, %c0_i32_0 : i32, i32
  }
  func.func @transform_6(%arg0: i32, %arg1: i32) -> (i32, i32) {
    %c0_i32 = arith.constant 0 : i32
    %c0_i32_0 = arith.constant 0 : i32
    %c0_i32_1 = arith.constant 0 : i32
    return %c0_i32, %c0_i32_0 : i32, i32
  }
  func.func @transform_7(%arg0: i32, %arg1: i32) -> (i32, i32) {
    %c0_i32 = arith.constant 0 : i32
    %c0_i32_0 = arith.constant 0 : i32
    %c0_i32_1 = arith.constant 0 : i32
    return %c0_i32, %c0_i32_0 : i32, i32
  }
  func.func @transform_8(%arg0: i32, %arg1: i32) -> (i32, i32, i32) {
    %c0_i32 = arith.constant 0 : i32
    %c0_i32_0 = arith.constant 0 : i32
    return %arg0, %c0_i32, %arg1 : i32, i32, i32
  }
}

</mosaic_0001>

<bundles_post_ra>
// kernel: fasternet_block.1
= control target key start
LH: loop header
LB: loop body
LE: loop exit
PB: predicated region body
PF: predicated region fallthrough
CT: control target
= control target key end

     0   :  { %s1600_s27 = smov 0   ;;  %s1602_s28 = smov 0   ;;  %s1849_s0 = inlined_call_operand.vmem [shape: f32[2,8,256], index: 0, kind: input, shape index: {}, may-alias: {0,8}]   ;;  %s1850_s1 = inlined_call_operand.vmem [shape: f32[2,2,256], index: 1, kind: input, shape index: {}]   ;;  %s1851_s2 = inlined_call_operand.vmem [shape: bf16[9,2,2], index: 2, kind: input, shape index: {}]   ;;  %s1852_s3 = inlined_call_operand.vmem [shape: f32[9,1,256], index: 3, kind: input, shape index: {}]   ;;  %s1853_s4 = inlined_call_operand.vmem [shape: bf16[16,8], index: 4, kind: input, shape index: {}, may-alias: {4,5}]   ;;  %s1854_s5 = inlined_call_operand.vmem [shape: bf16[16,2], index: 5, kind: input, shape index: {}, may-alias: {4,5}]   ;;  %s1855_s6 = inlined_call_operand.vmem [shape: f32[16,1], index: 6, kind: input, shape index: {}]   ;;  %s1856_s7 = inlined_call_operand.vmem [shape: bf16[8,16], index: 7, kind: input, shape index: {}]   ;;  %s1857_s8 = inlined_call_operand.vmem [shape: f32[2,8,256], index: 8, kind: output, shape index: {}, may-alias: {0,8}]  }
   0x1   :  { %s1604_s29 = smov 0  }
   0x2 LB: > { %s30_s30 = sadd.s32 1, %s1539_s28  ;;  %p1428_p0 = scmp.ge.s32.totalorder %s1543_s29, 1  ;;  %s1543_s29 = sphi %s1604_s29, %s18_s29   ;;  %s1539_s28 = sphi %s1602_s28, %s1859_s28   ;;  %s1535_s27 = sphi %s1600_s27, %s1858_s27  }
   0x3   : > { %p32_p1 = scmp.ge.s32.totalorder %s30_s30, 2  ;;  %p293_p2 = scmp.lt.s32.totalorder %s1543_s29, 3 }
   0x5   : > { %s1861_s30 = smov (%p32_p1, %s30_s30), 0  ;;  %p294_p3 = pnand %p1428_p0, %p293_p2 }
   0x6   : > { %p341_p4 = scmp.lt.s32.totalorder (!%p294_p3), %s1535_s27, 1  ;;  %s1546_s15 = smov (!%p294_p3), 17  }
   0x7   : > { %297 = sbr.rel (%p294_p3) target bundleno = 808 (0x328), region = 52  ;;  %s1547_s16 = smov (!%p294_p3), 16  }
   0x8   : > { %s1549_s17 = smov (!%p294_p3), 15   ;;  %s1550_s18 = smov (!%p294_p3), 1  }
   0x9   : > { %s1551_s19 = smov (!%p294_p3), 127   ;;  %s1552_s20 = smov (!%p294_p3), 113  }
   0xa   : > { %s1553_s21 = smov (!%p294_p3), 112   ;;  %s1554_s22 = smov (!%p294_p3), 111  }
   0xc   : > { %v375_v0 = vlaneseq  ;;  %v1545_v1 = vmov 1983009808   ;;  %s1863_s27 = smov (!%p341_p4, %s1535_s27), 1  ;;  %v1449_v10 = vld [vmem:[%s1852_s3 + $0x8] sm:$0x3]  ;;  %v1548_v14 = vmov 0  }
   0xd   : > { %v373_v2 = vunpack.c.l.s4 %v1545_v1  ;;  %s1481_s9 = sshll.u32 %s1863_s27, 2  ;;  %477 = vmatprep.mubr.bf16.mxu0 %v1548_v14  ;;  %527 = vmatprep.mubr.bf16.mxu1 %v1548_v14  ;;  %v391_v20 = vld [vmem:[%s1852_s3] sm:$0x3]  ;;  %v1435_v21 = vld [vmem:[%s1852_s3 + $0x2] sm:$0x3]  ;;  %vm438_vm3 = vcmask 1040384  }
   0xe   : > { %v376_v3 = vshrl.u32 %v375_v0, 7  ;;  %s354_s12 = scalar_lea.vmem %s1850_s1, %s1481_s9  ;;  %1517 = vset.pattern.permute.xlu0 %v1548_v14  ;;  %1518 = vset.pattern.permute.xlu1 %v1548_v14  ;;  %v1661_v19 = vand.u32 127, %v375_v0  ;;  %v1441_v24 = vld [vmem:[%s1852_s3 + $0x4] sm:$0x3]  ;;  %v1445_v33 = vld [vmem:[%s1852_s3 + $0x6] sm:$0x3] }
   0xf   : > { %v374_v4 = vunpack.c.0.s8 %v373_v2  ;;  %v370_v6 = vld [vmem:[%s354_s12] sm:$0xf]  ;;  %v1453_v57 = vld [vmem:[%s1852_s3 + $0xa] sm:$0x3]  ;;  %vm434_vm5 = vcmask 15360   ;;  %vm1201_vm10 = vcmask 1043456  }
  0x10   : > { %v1626_v8 = vsub.s32 0, %v376_v3  ;;  %v1628_v9 = vsub.s32 1, %v376_v3  ;;  %vm388_vm0 = vcmp.lt.s32.totalorder %v1661_v19, 17  ;;  %vm412_vm1 = vcmp.lt.s32.totalorder %v1661_v19, 16  ;;  %v1436_v58 = vld [vmem:[%s1851_s2 + $0x1] sm:$0x1] }
  0x11   : > { %v377_v5 = vsub.s32 %v374_v4, %v376_v3  ;;  %vm540_vm2 = vcmp.lt.s32.totalorder %v1661_v19, 15  ;;  %vm618_vm4 = vcmp.lt.s32.totalorder %v1661_v19, 1  ;;  %v407_v59 = vld [vmem:[%s1851_s2] sm:$0x1]  ;;  %vm784_vm6 = vcmp.lt.s32.totalorder %v1661_v19, 127 }
  0x12   : > { %v698_v12 = vrot.slane %v1449_v10, %v1626_v8  ;;  %v702_v13 = vrot.slane %v1449_v10, %v1628_v9  ;;  %v396_v25 = vrot.slane %v391_v20, %v1626_v8  ;;  %v421_v26 = vrot.slane %v1435_v21, %v1626_v8 }
  0x13   : > { %v1624_v7 = vrot.slane %v370_v6, %v377_v5  ;;  %v425_v27 = vrot.slane %v1435_v21, %v1628_v9  ;;  %v400_v28 = vrot.slane %v391_v20, %v1628_v9  ;;  %v549_v31 = vrot.slane %v1441_v24, %v1626_v8 }
  0x14   : > { %v703_v15 = vcombine.low %v698_v12, %v702_v13  ;;  %v553_v32 = vrot.slane %v1441_v24, %v1628_v9  ;;  %v627_v42 = vrot.slane %v1445_v33, %v1626_v8  ;;  %v631_v51 = vrot.slane %v1445_v33, %v1628_v9  ;;  %v1457_v12 = vld [vmem:[%s1852_s3 + $0xc] sm:$0x3] }
  0x15   : > { %382 = vrot.lane.b32.xlu1 %v1624_v7, %s1546_s15  ;;  %408 = vrot.lane.b32.xlu0 %v1624_v7, %s1547_s16  ;;  %v1637_v11 = vcombine.high %v1624_v7, %v1624_v7  ;;  %v793_v2 = vrot.slane %v1453_v57, %v1626_v8  ;;  %v797_v10 = vrot.slane %v1453_v57, %v1628_v9  ;;  %vm862_vm7 = vcmp.lt.s32.totalorder %v1661_v19, 113 }
  0x16   : > { %v710_v16 = vrot.slane %v703_v15, %v377_v5  ;;  %vm940_vm8 = vcmp.lt.s32.totalorder %v1661_v19, 112  ;;  %vm1018_vm9 = vcmp.lt.s32.totalorder %v1661_v19, 111  ;;  %vm1197_vm11 = vcmask 64512  }
  0x17   : > { %vm1274_vm12 = vcmask 130048  }
  0x18   : > { %v712_v17 = vmul.f32 %v710_v16, %v370_v6 }
  0x19   : > { %384 = vrot.lane.b32.xlu1 %v1637_v11, %s1546_s15  ;;  %410 = vrot.lane.b32.xlu0 %v1637_v11, %s1547_s16 }
  0x1a   : > { %v1649_v18 = vrot.slane %v712_v17, %v377_v5 }
  0x1c   : > { %v721_v52 = vcombine.high %v1649_v18, %v1649_v18  ;;  %v724_v20 = vpack.c.bf16 %v1649_v18, %v1649_v18  ;;  %v875_v18 = vrot.slane %v1457_v12, %v1628_v9 }
  0x1d   : > { %538 = vrot.lane.b32.xlu1 %v1637_v11, %s1549_s17  ;;  %536 = vrot.lane.b32.xlu0 %v1624_v7, %s1549_s17 }
  0x1e   : > { %v725_v3 = vpack.c.bf16 %v721_v52, %v721_v52 }
  0x21   : > { %616 = vrot.lane.b32.xlu1 %v1637_v11, %s1550_s18  ;;  %614 = vrot.lane.b32.xlu0 %v1624_v7, %s1550_s18 }
  0x25   : > { %782 = vrot.lane.b32.xlu1 %v1637_v11, %s1551_s19  ;;  %780 = vrot.lane.b32.xlu0 %v1624_v7, %s1551_s19 }
  0x29   : > { %860 = vrot.lane.b32.xlu1 %v1637_v11, %s1552_s20  ;;  %858 = vrot.lane.b32.xlu0 %v1624_v7, %s1552_s20 }
  0x2d   : > { %938 = vrot.lane.b32.xlu1 %v1637_v11, %s1553_s21  ;;  %936 = vrot.lane.b32.xlu0 %v1624_v7, %s1553_s21  ;;  %s1480_s21 = sshll.u32 %s1863_s27, 4 }
  0x2e   : > { %s348_s24 = scalar_lea.vmem %s1849_s0, %s1480_s21  ;;  %s363_s19 = scalar_lea.vmem %s1857_s8, %s1480_s21 }
  0x31   : > { %1016 = vrot.lane.b32.xlu1 %v1637_v11, %s1554_s22  ;;  %1014 = vrot.lane.b32.xlu0 %v1624_v7, %s1554_s22 }
  0x87   : > { %v383_v22 = vpop.permute.xlu1 %382  ;;  %v409_v23 = vpop.permute.xlu0 %408 }
  0x8b   : > { %v385_v29 = vpop.permute.xlu1 %384  ;;  %v411_v30 = vpop.permute.xlu0 %410 }
  0x8c   : > { %v389_v34 = vsel %vm388_vm0, %v383_v22, %v385_v29  ;;  %v390_v35 = vsel %vm388_vm0, %v385_v29, %v383_v22  ;;  %v413_v36 = vsel %vm412_vm1, %v409_v23, %v411_v30  ;;  %v414_v37 = vsel %vm412_vm1, %v411_v30, %v409_v23  ;;  %v1446_v29 = vld [vmem:[%s1851_s2 + $0x3] sm:$0x1] }
  0x8d   : > { %v403_v38 = vmul.f32 %v396_v25, %v390_v35  ;;  %v428_v39 = vmul.f32 %v421_v26, %v414_v37  ;;  %v429_v40 = vmul.f32 %v425_v27, %v413_v36  ;;  %v404_v41 = vmul.f32 %v400_v28, %v389_v34  ;;  %v1461_v27 = vld [vmem:[%s1852_s3 + $0xe] sm:$0x3]  ;;  %v1442_v28 = vld [vmem:[%s1851_s2 + $0x2] sm:$0x1] }
  0x8e   : > { %v871_v23 = vrot.slane %v1457_v12, %v1626_v8  ;;  %v732_v34 = vsel %vm438_vm3, %v724_v20, 0  ;;  %v949_v37 = vrot.slane %v1461_v27, %v1626_v8 }
  0x8f   : > { %v539_v43 = vpop.permute.xlu1 %538  ;;  %v537_v44 = vpop.permute.xlu0 %536  ;;  %v431_v45 = vpack.c.bf16 %v429_v40, %v429_v40  ;;  %v406_v46 = vpack.c.bf16 %v404_v41, %v404_v41  ;;  %v430_v47 = vpack.c.bf16 %v428_v39, %v428_v39  ;;  %v405_v48 = vpack.c.bf16 %v403_v38, %v403_v38 }
  0x90   : > { %v541_v49 = vsel %vm540_vm2, %v537_v44, %v539_v43  ;;  %v542_v50 = vsel %vm540_vm2, %v539_v43, %v537_v44  ;;  %v953_v41 = vrot.slane %v1461_v27, %v1628_v9 }
  0x91   : > { %v556_v53 = vmul.f32 %v549_v31, %v542_v50  ;;  %v557_v54 = vmul.f32 %v553_v32, %v541_v49  ;;  %1437 = vmatprep.subr.msk.bf16.mxu0 %vm438_vm3, %v431_v45  ;;  %1439 = vmatprep.subr.msk.bf16.mxu1 %vm438_vm3, %v406_v46  ;;  %v440_v55 = vsel %vm438_vm3, %v430_v47, 0  ;;  %v490_v56 = vsel %vm438_vm3, %v405_v48, 0 }
  0x92   : > { %460 = vmatpush1.bf16.msra.mxu0 %v440_v55  ;;  %510 = vmatpush1.bf16.msra.mxu1 %v490_v56 }
  0x93   : > { %v558_v60 = vpack.c.bf16 %v556_v53, %v556_v53  ;;  %v559_v61 = vpack.c.bf16 %v557_v54, %v557_v54  ;;  %v617_v62 = vpop.permute.xlu1 %616  ;;  %v615_v63 = vpop.permute.xlu0 %614  ;;  %v1450_v53 = vld [vmem:[%s1851_s2 + $0x4] sm:$0x1]  ;;  %v1454_v54 = vld [vmem:[%s1851_s2 + $0x5] sm:$0x1] }
  0x94   : > { %v619_v0 = vsel %vm618_vm4, %v615_v63, %v617_v62  ;;  %v620_v1 = vsel %vm618_vm4, %v617_v62, %v615_v63 }
  0x95   : > { %v634_v4 = vmul.f32 %v627_v42, %v620_v1  ;;  %v635_v5 = vmul.f32 %v631_v51, %v619_v0  ;;  %1438 = vmatmul.mubr.msk.bf16.vlgmr.msra.gmra.mxu0 %vm434_vm5, %v1436_v58  ;;  %1440 = vmatmul.mubr.msk.bf16.vlgmr.msra.gmra.mxu1 %vm434_vm5, %v407_v59  ;;  %v566_v6 = vsel %vm438_vm3, %v558_v60, 0  ;;  %v1465_v42 = vld [vmem:[%s1852_s3 + $0x10] sm:$0x3]  ;;  %v1458_v0 = vld [vmem:[%s1851_s2 + $0x6] sm:$0x1] }
  0x96   : > { %1443 = vmatprep.subr.msk.bf16.mxu0 %vm438_vm3, %v559_v61  ;;  %603 = vmatprep.mubr.bf16.mxu0 %v1548_v14  ;;  %v1027_v51 = vrot.slane %v1465_v42, %v1626_v8  ;;  %v1031_v52 = vrot.slane %v1465_v42, %v1628_v9  ;;  %v1462_v1 = vld [vmem:[%s1851_s2 + $0x7] sm:$0x1] }
  0x97   : > { %v636_v13 = vpack.c.bf16 %v634_v4, %v634_v4  ;;  %v637_v15 = vpack.c.bf16 %v635_v5, %v635_v5  ;;  %586 = vmatpush1.bf16.msra.mxu0 %v566_v6  ;;  %v783_v16 = vpop.permute.xlu1 %782  ;;  %v781_v17 = vpop.permute.xlu0 %780  ;;  %681 = vmatprep.mubr.bf16.mxu1 %v1548_v14  ;;  %v1804_v4 = vld [vmem:[%s348_s24 + $0x8] sm:$0xff]  ;;  %v1806_v5 = vld [vmem:[%s348_s24] sm:$0xff] }
  0x98   : > { %v785_v21 = vsel %vm784_vm6, %v781_v17, %v783_v16  ;;  %v786_v22 = vsel %vm784_vm6, %v783_v16, %v781_v17  ;;  %1451 = vmatprep.subr.msk.bf16.mxu0 %vm438_vm3, %v725_v3  ;;  %v1466_v3 = vld [vmem:[%s1851_s2 + $0x8] sm:$0x1]  ;;  %v1117_v6 = vpack.c.bf16 %v1804_v4, %v1804_v4 }
  0x99   : > { %1447 = vmatprep.subr.msk.bf16.mxu1 %vm438_vm3, %v637_v15  ;;  %v644_v24 = vsel %vm438_vm3, %v636_v13, 0  ;;  %v800_v25 = vmul.f32 %v793_v2, %v785_v21  ;;  %v801_v26 = vmul.f32 %v797_v10, %v786_v22  ;;  %v1116_v10 = vpack.c.bf16 %v1806_v5, %v1806_v5  ;;  %v1519_v13 = vld [vmem:[%s1853_s4] sm:$0xff]   ;;  %v1252_v16 = vld [vmem:[%s1855_s6 + $0x8] sm:$0xff] }
  0x9a   : > { %664 = vmatpush1.bf16.msra.mxu1 %v644_v24  ;;  %v1251_v15 = vld [vmem:[%s1855_s6] sm:$0xff]  ;;  %1260 = vperm.xlu1 %1518, %v1252_v16  }
  0x9b   : > { %v802_v30 = vpack.c.bf16 %v800_v25, %v800_v25  ;;  %v803_v31 = vpack.c.bf16 %v801_v26, %v801_v26  ;;  %v861_v32 = vpop.permute.xlu1 %860  ;;  %v859_v33 = vpop.permute.xlu0 %858  ;;  %v1203_v12 = vsel %vm1201_vm10, %v1116_v10, 0  ;;  %1255 = vperm.xlu0 %1517, %v1251_v15  }
  0x9c   : > { %v863_v35 = vsel %vm862_vm7, %v859_v33, %v861_v32  ;;  %v864_v36 = vsel %vm862_vm7, %v861_v32, %v859_v33 }
  0x9d   : > { %1444 = vmatmul.mubr.msk.bf16.vlgmr.msra.gmra.mxu0 %vm434_vm5, %v1442_v28  ;;  %1448 = vmatmul.mubr.msk.bf16.vlgmr.msra.gmra.mxu1 %vm434_vm5, %v1446_v29  ;;  %v878_v38 = vmul.f32 %v871_v23, %v863_v35  ;;  %v879_v39 = vmul.f32 %v875_v18, %v864_v36  ;;  %v810_v40 = vsel %vm438_vm3, %v802_v30, 0 }
  0x9e   : > { %1455 = vmatprep.subr.msk.bf16.mxu1 %vm438_vm3, %v803_v31  ;;  %752 = vmatpush1.bf16.msra.mxu0 %v732_v34 }
  0x9f   : > { %v880_v43 = vpack.c.bf16 %v878_v38, %v878_v38  ;;  %v881_v44 = vpack.c.bf16 %v879_v39, %v879_v39  ;;  %830 = vmatpush1.bf16.msra.mxu1 %v810_v40  ;;  %v939_v45 = vpop.permute.xlu1 %938  ;;  %v937_v46 = vpop.permute.xlu0 %936  ;;  %769 = vmatprep.mubr.bf16.mxu0 %v1548_v14 }
  0xa0   : > { %v941_v47 = vsel %vm940_vm8, %v937_v46, %v939_v45  ;;  %v942_v48 = vsel %vm940_vm8, %v939_v45, %v937_v46  ;;  %847 = vmatprep.mubr.bf16.mxu1 %v1548_v14 }
  0xa1   : > { %v956_v49 = vmul.f32 %v949_v37, %v941_v47  ;;  %v957_v50 = vmul.f32 %v953_v41, %v942_v48  ;;  %1459 = vmatprep.subr.msk.bf16.mxu0 %vm438_vm3, %v881_v44  ;;  %v888_v19 = vsel %vm438_vm3, %v880_v43, 0 }
  0xa3   : > { %v958_v55 = vpack.c.bf16 %v956_v49, %v956_v49  ;;  %v959_v56 = vpack.c.bf16 %v957_v50, %v957_v50  ;;  %v1017_v57 = vpop.permute.xlu1 %1016  ;;  %v1015_v58 = vpop.permute.xlu0 %1014 }
  0xa4   : > { %v1019_v59 = vsel %vm1018_vm9, %v1015_v58, %v1017_v57  ;;  %v1020_v60 = vsel %vm1018_vm9, %v1017_v57, %v1015_v58 }
  0xa5   : > { %1452 = vmatmul.mubr.msk.bf16.vlgmr.msra.gmra.mxu0 %vm434_vm5, %v1450_v53  ;;  %1456 = vmatmul.mubr.msk.bf16.vlgmr.msra.gmra.mxu1 %vm434_vm5, %v1454_v54  ;;  %v966_v8 = vsel %vm438_vm3, %v958_v55, 0  ;;  %v1034_v9 = vmul.f32 %v1027_v51, %v1019_v59  ;;  %v1035_v61 = vmul.f32 %v1031_v52, %v1020_v60 }
  0xa6   : > { %1463 = vmatprep.subr.msk.bf16.mxu1 %vm438_vm3, %v959_v56  ;;  %908 = vmatpush1.bf16.msra.mxu0 %v888_v19 }
  0xa7   : > { %986 = vmatpush1.bf16.msra.mxu1 %v966_v8  ;;  %v1036_v62 = vpack.c.bf16 %v1034_v9, %v1034_v9  ;;  %v1037_v63 = vpack.c.bf16 %v1035_v61, %v1035_v61  ;;  %925 = vmatprep.mubr.bf16.mxu0 %v1548_v14 }
  0xa8   : > { %1003 = vmatprep.mubr.bf16.mxu1 %v1548_v14 }
  0xa9   : > { %1467 = vmatprep.subr.msk.bf16.mxu0 %vm438_vm3, %v1037_v63  ;;  %v1044_v2 = vsel %vm438_vm3, %v1036_v62, 0 }
  0xad   : > { %1460 = vmatmul.mubr.msk.bf16.vlgmr.msra.gmra.mxu0 %vm434_vm5, %v1458_v0  ;;  %1464 = vmatmul.mubr.msk.bf16.vlgmr.msra.gmra.mxu1 %vm434_vm5, %v1462_v1 }
  0xae   : > { %1064 = vmatpush1.bf16.msra.mxu0 %v1044_v2  ;;  %1081 = vmatprep.mubr.bf16.mxu0 %v1548_v14 }
  0xaf   : > { %1181 = vmatprep.mubr.bf16.mxu1 %v1548_v14  ;;  %1475 = vmatprep.subr.msk.bf16.mxu0 %vm1201_vm10, %v1117_v6 }
  0xb5   : > { %1468 = vmatmul.mubr.msk.bf16.vlgmr.msra.gmra.mxu0 %vm434_vm5, %v1466_v3 }
  0xb6   : > { %1240 = vmatprep.mubr.bf16.mxu0 %v1548_v14  ;;  %1223 = vmatpush1.bf16.msra.mxu0 %v1203_v12 }
  0xbd   : > { %1476 = vmatmul.mubr.msk.bf16.vlgmr.msra.gmra.mxu0 %vm1197_vm11, %v1519_v13 }
 0x155   : > { %v479_v17 = vpop.f32.mrf.mxu0  ;;  %v529_v20 = vpop.f32.mrf.mxu1 }
 0x156   : > { %v530_v32 = vadd.f32 %v529_v20, %v479_v17  ;;  %v1520_v20 = vld [vmem:[%s1854_s5] sm:$0xff]  }
 0x157   : > { %v481_v21 = vpop.f32.mrf.mxu0  ;;  %v531_v22 = vpop.f32.mrf.mxu1 }
 0x158   : > { %v532_v35 = vadd.f32 %v531_v22, %v481_v21 }
 0x159   : > { %v483_v23 = vpop.f32.mrf.mxu0  ;;  %v533_v24 = vpop.f32.mrf.mxu1 }
 0x15b   : > { %v484_v25 = vpop.f32.mrf.mxu0  ;;  %v534_v26 = vpop.f32.mrf.mxu1 }
 0x15d   : > { %v605_v18 = vpop.f32.mrf.mxu0  ;;  %v683_v27 = vpop.f32.mrf.mxu1 }
 0x15e   : > { %v612_v36 = vadd.f32 %v605_v18, %v530_v32  ;;  %v1261_v18 = vpop.permute.xlu1 %1260 }
 0x15f   : > { %v607_v28 = vpop.f32.mrf.mxu0  ;;  %v685_v29 = vpop.f32.mrf.mxu1 }
 0x160   : > { %v613_v39 = vadd.f32 %v607_v28, %v532_v35  ;;  %v690_v42 = vadd.f32 %v683_v27, %v612_v36  ;;  %v1256_v27 = vpop.permute.xlu0 %1255 }
 0x161   : > { %v609_v30 = vpop.f32.mrf.mxu0  ;;  %v687_v31 = vpop.f32.mrf.mxu1 }
 0x162   : > { %v691_v45 = vadd.f32 %v685_v29, %v613_v39 }
 0x163   : > { %v610_v33 = vpop.f32.mrf.mxu0  ;;  %v688_v34 = vpop.f32.mrf.mxu1 }
 0x165   : > { %v771_v37 = vpop.f32.mrf.mxu0  ;;  %v849_v38 = vpop.f32.mrf.mxu1 }
 0x166   : > { %v778_v46 = vadd.f32 %v771_v37, %v690_v42 }
 0x167   : > { %v773_v40 = vpop.f32.mrf.mxu0  ;;  %v851_v41 = vpop.f32.mrf.mxu1 }
 0x168   : > { %v779_v49 = vadd.f32 %v773_v40, %v691_v45  ;;  %v856_v52 = vadd.f32 %v849_v38, %v778_v46 }
 0x169   : > { %v775_v43 = vpop.f32.mrf.mxu0  ;;  %v853_v44 = vpop.f32.mrf.mxu1 }
 0x16a   : > { %v857_v55 = vadd.f32 %v851_v41, %v779_v49  ;;  %v1271_v41 = vld [vmem:[%s1856_s7] sm:$0xf] }
 0x16b   : > { %v776_v47 = vpop.f32.mrf.mxu0  ;;  %v854_v48 = vpop.f32.mrf.mxu1 }
 0x16d   : > { %v927_v50 = vpop.f32.mrf.mxu0  ;;  %v1005_v51 = vpop.f32.mrf.mxu1 }
 0x16e   : > { %v934_v56 = vadd.f32 %v927_v50, %v856_v52 }
 0x16f   : > { %v929_v53 = vpop.f32.mrf.mxu0  ;;  %v1007_v54 = vpop.f32.mrf.mxu1 }
 0x170   : > { %v935_v58 = vadd.f32 %v929_v53, %v857_v55  ;;  %v1012_v8 = vadd.f32 %v1005_v51, %v934_v56 }
 0x171   : > { %v931_v19 = vpop.f32.mrf.mxu0  ;;  %v1009_v57 = vpop.f32.mrf.mxu1 }
 0x172   : > { %v1013_v61 = vadd.f32 %v1007_v54, %v935_v58 }
 0x173   : > { %v932_v59 = vpop.f32.mrf.mxu0  ;;  %v1010_v60 = vpop.f32.mrf.mxu1 }
 0x175   : > { %v1083_v9 = vpop.f32.mrf.mxu0 }
 0x176   : > { %v1090_v62 = vadd.f32 %v1083_v9, %v1012_v8 }
 0x177   : > { %v1085_v63 = vpop.f32.mrf.mxu0 }
 0x178   : > { %v1091_v0 = vadd.f32 %v1085_v63, %v1013_v61  ;;  %v1092_v2 = vsub.f32 %v1090_v62, %v1624_v7 }
 0x179   : > { %v1087_v1 = vpop.f32.mrf.mxu0 }
 0x17a   : > { %v1093_v3 = vsub.f32 %v1091_v0, %v1637_v11 }
 0x17b   : > { %v1088_v6 = vpop.f32.mrf.mxu0 }
 0x17c   : > { %v1096_v10 = vcombine.low %v1092_v2, %v1093_v3 }
 0x17d   : > { %v1242_v7 = vpop.f32.mrf.mxu0 }
 0x17e   : > { %1469 = vst.sshfl [vmem:[#allocation2] sm:$0x33 pattern:$0x76325410] %v1096_v10 }
 0x17f   : > { %v1244_v11 = vpop.f32.mrf.mxu0 }
 0x181   : > { %v1246_v22 = vpop.f32.mrf.mxu0 }
 0x183   : > { %v1248_v29 = vpop.f32.mrf.mxu0 }
 0x185   : > { %v1470_v12 = vld.sshfl [vmem:[#allocation2] sm:$0x33 pattern:$0x76325410] }
 0x186   : > { %v1128_v13 = vcombine.high %v1470_v12, %v1470_v12  ;;  %v1131_v15 = vpack.c.bf16 %v1470_v12, %v1470_v12 }
 0x188   : > { %v1132_v16 = vpack.c.bf16 %v1128_v13, %v1128_v13  ;;  %v1144_v17 = vsel %vm438_vm3, %v1131_v15, 0 }
 0x18a   : > { %1472 = vmatprep.subr.msk.bf16.mxu1 %vm438_vm3, %v1132_v16 }
 0x18b   : > { %1164 = vmatpush1.bf16.msra.mxu1 %v1144_v17 }
 0x18e   : > { %1473 = vmatmul.mubr.msk.bf16.vlgmr.msra.gmra.mxu1 %vm434_vm5, %v1520_v20 }
 0x18f   : > { %1310 = vmatprep.mubr.bf16.mxu1 %v1548_v14 }
 0x24e   : > { %v1183_v21 = vpop.f32.mrf.mxu1 }
 0x24f   : > { %v1243_v25 = vadd.f32 %v1242_v7, %v1183_v21 }
 0x250   : > { %v1185_v23 = vpop.f32.mrf.mxu1 }
 0x251   : > { %v1245_v24 = vadd.f32 %v1244_v11, %v1185_v23  ;;  %v1263_v34 = vadd.f32 %v1256_v27, %v1243_v25 }
 0x252   : > { %v1187_v26 = vpop.f32.mrf.mxu1 }
 0x253   : > { %v1247_v28 = vadd.f32 %v1246_v22, %v1187_v26  ;;  %v1264_v31 = vadd.f32 %v1256_v27, %v1245_v24  ;;  %v1267_v38 = vmax.f32 %v1263_v34, 0.0 }
 0x254   : > { %v1189_v30 = vpop.f32.mrf.mxu1 }
 0x255   : > { %v1265_v32 = vadd.f32 %v1261_v18, %v1247_v28  ;;  %v1249_v33 = vadd.f32 %v1248_v29, %v1189_v30  ;;  %v1268_v36 = vmax.f32 %v1264_v31, 0.0 }
 0x257   : > { %v1266_v35 = vadd.f32 %v1261_v18, %v1249_v33  ;;  %v1269_v14 = vmax.f32 %v1265_v32, 0.0 }
 0x259   : > { %v1270_v37 = vmax.f32 %v1266_v35, 0.0  ;;  %v1272_v40 = vpack.c.bf16 %v1269_v14, %v1267_v38 }
 0x25b   : > { %v1273_v39 = vpack.c.bf16 %v1270_v37, %v1268_v36 }
 0x25d   : > { %1292 = vmatprep.subr.bf16.mxu1 %v1273_v39 }
 0x25e   : > { %1293 = vmatpush1.bf16.msra.mxu1 %v1272_v40 }
 0x261   : > { %1477 = vmatmul.mubr.msk.bf16.vlgmr.msra.gmra.mxu1 %vm1274_vm12, %v1271_v41 }
 0x321   : > { %v1312_v42 = vpop.f32.mrf.mxu1 }
 0x322   : > { %v1319_v43 = vadd.f32 %v1312_v42, %v1806_v5 }
 0x323   : > { %v1314_v44 = vpop.f32.mrf.mxu1 }
 0x324   : > { %1321 = vst [vmem:[%s363_s19] sm:$0xff] %v1319_v43  ;;  %v1320_v45 = vadd.f32 %v1314_v44, %v1804_v4 }
 0x325   : > { %v1316_v46 = vpop.f32.mrf.mxu1 }
 0x326   : > { %1322 = vst [vmem:[%s363_s19 + $0x8] sm:$0xff] %v1320_v45 }
 0x327   : > { %v1317_v47 = vpop.f32.mrf.mxu1 }
 0x328 PF: > { %s18_s29 = sadd.s32 1, %s1543_s29   ;;  %s1858_s27 = smov %s1539_s28 }
 0x329   : > { %p15_p5 = scmp.ge.s32.totalorder %s18_s29, 4   ;;  %s1859_s28 = smov %s1861_s30 }
 0x32b   :  { %17 = sbr.rel (!%p15_p5) target bundleno = 2 (0x2), region = 106 }

</bundles_post_ra>
